<compile_context>
chip_gen: v6e
topology: v6e:2x2x1
jax: 0.10.0
libtpu: 0.0.40
codegen_flags: <defaults>
</compile_context>

<pallas_src>
import jax
import jax.numpy as jnp
from jax.experimental import pallas as pl
from jax.experimental.pallas import tpu as pltpu


def _loot_loss_sums_kernel(pred_ref, targ_ref,
                           inter_ref, a_ref, b_ref, bce_ref, nnz_ref, ss_ref):
    """Accumulate the six global sums LootLoss needs, one spatial chunk per step.

    pred_ref / targ_ref : (B, C, L) VMEM blocks (channel 0 = prob, 1: = shifts).
    The six outputs are (1, 1, 1) accumulators; their block index is constant
    along the reduce axis, so they stay resident in VMEM across it.
    """
    step = pl.program_id(1)

    @pl.when(step == 0)
    def _init():
        inter_ref[...] = jnp.zeros_like(inter_ref)
        a_ref[...] = jnp.zeros_like(a_ref)
        b_ref[...] = jnp.zeros_like(b_ref)
        bce_ref[...] = jnp.zeros_like(bce_ref)
        nnz_ref[...] = jnp.zeros_like(nnz_ref)
        ss_ref[...] = jnp.zeros_like(ss_ref)

    # Upcast in-kernel: free for f32 inputs, saves DMA bytes for bf16 inputs.
    p = pred_ref[:, 0:1, :].astype(jnp.float32)    # (B, 1, L) prob predictions
    t = targ_ref[:, 0:1, :].astype(jnp.float32)    # (B, 1, L) prob targets
    sp = pred_ref[:, 1:, :].astype(jnp.float32)    # (B, S, L) shift predictions
    st = targ_ref[:, 1:, :].astype(jnp.float32)    # (B, S, L) shift targets

    # Dice partials.
    inter_ref[...] += jnp.sum(p * t, keepdims=True)
    a_ref[...] += jnp.sum(p * p, keepdims=True)
    b_ref[...] += jnp.sum(t * t, keepdims=True)

    # BCE partial (PyTorch BCELoss clamps log at -100).
    logp = jnp.maximum(jnp.log(p), -100.0)
    log1mp = jnp.maximum(jnp.log(1.0 - p), -100.0)
    bce_ref[...] += jnp.sum(-(t * logp + (1.0 - t) * log1mp), keepdims=True)

    # Masked shift MSE partials: mask = (prob target != 0), broadcast over S.
    mask = (t != 0.0).astype(jnp.float32)          # (B, 1, L)
    nnz_ref[...] += jnp.sum(mask, keepdims=True)
    d = sp - st
    ss_ref[...] += jnp.sum(d * d * mask, keepdims=True)


def _pick_lane_tile(hw, rows, bytes_per_elem, target_bytes=1 << 20):
    """Largest multiple-of-128 divisor of hw with rows*L*bytes <= target, else hw."""
    if hw % 128 != 0:
        return hw                       # fallback: single whole-array block
    max_l = max(128, target_bytes // max(1, rows * bytes_per_elem))
    l = (min(hw, max_l) // 128) * 128
    while l >= 128:
        if hw % l == 0:
            return l
        l -= 128
    return hw


def loot_loss(inputs, target, lambda1=1.0, lambda2=1.0):
    """LootLoss forward.  inputs/target: (B, C, H, W); channel 0 = probs."""
    if lambda1 < 0 or lambda2 < 0:
        raise ValueError("lambda1/lambda2 must be >= 0")
    B, C, H, W = inputs.shape
    S = C - 1
    HW = H * W
    BHW = B * HW

    # Free reshapes only (natural NCHW order kept -> no HBM transpose copy).
    pred = inputs.reshape(B, C, HW)
    targ = target.reshape(B, C, HW)

    L = _pick_lane_tile(HW, B * C, inputs.dtype.itemsize)
    chunks = HW // L
    # Leading "parallel" axis so v7x's two TensorCores each reduce half the
    # chunks; single TC on v5e/v6e just runs both sequentially.
    splits = 2 if (chunks >= 2 and chunks % 2 == 0) else 1
    chunks_per_split = chunks // splits

    def in_map(c, i):
        return (0, 0, c * chunks_per_split + i)

    def out_map(c, i):
        return (c, 0, 0)

    sum_shape = jax.ShapeDtypeStruct((splits, 1, 1), jnp.float32)
    out_spec = pl.BlockSpec((1, 1, 1), out_map)

    grid_spec = pltpu.PrefetchScalarGridSpec(
        num_scalar_prefetch=0,
        grid=(splits, chunks_per_split),
        in_specs=[
            pl.BlockSpec((B, C, L), in_map),
            pl.BlockSpec((B, C, L), in_map),
        ],
        out_specs=[out_spec] * 6,
    )

    sums = pl.pallas_call(
        _loot_loss_sums_kernel,
        grid_spec=grid_spec,
        out_shape=[sum_shape] * 6,
        compiler_params=pltpu.CompilerParams(
            dimension_semantics=("parallel", "arbitrary")),
    )(pred, targ)
    inter, a_sum, b_sum, bce_sum, nnz, ss_sum = [jnp.sum(s) for s in sums]

    # Scalar epilogue (matches the PyTorch reference).
    smooth = 1.0
    dice = 1.0 - (2.0 * inter + smooth) / (a_sum + b_sum + smooth)
    bce = bce_sum / BHW
    probs_loss = dice + bce
    # nnz == 0 -> 0/0 = NaN, matching the PyTorch gather-over-empty-index-set
    # behavior of ShiftsMSELoss.
    shifts_loss = ss_sum / (nnz * S)
    return probs_loss * jnp.float32(lambda1) + shifts_loss * jnp.float32(lambda2)


def _loot_loss_reference(inputs, target, lambda1, lambda2):
    """Pure-JAX reference for a correctness sanity check."""
    S = inputs.shape[1] - 1
    p = inputs[:, 0].reshape(-1).astype(jnp.float32)
    t = target[:, 0].reshape(-1).astype(jnp.float32)
    smooth = 1.0
    dice = 1.0 - (2.0 * jnp.sum(p * t) + smooth) / (
        jnp.sum(p * p) + jnp.sum(t * t) + smooth)
    logp = jnp.maximum(jnp.log(p), -100.0)
    log1mp = jnp.maximum(jnp.log(1.0 - p), -100.0)
    bce = jnp.mean(-(t * logp + (1.0 - t) * log1mp))
    mask = (target[:, 0] != 0.0).astype(jnp.float32)[:, None]      # (B,1,H,W)
    d = (inputs[:, 1:] - target[:, 1:]).astype(jnp.float32)
    nnz = jnp.sum(mask)
    shifts = jnp.sum(d * d * mask) / (nnz * S)
    return (dice + bce) * lambda1 + shifts * lambda2


if __name__ == "__main__":
    key = jax.random.PRNGKey(0)
    k1, k2, k3, k4 = jax.random.split(key, 4)

    B, C, H, W = 2, 4, 16, 16  # channel 0 = probability map, 1..3 = shift maps

    # Predictions: prob channel must lie in (0,1) for BCE.
    pred_prob = jax.nn.sigmoid(jax.random.normal(k1, (B, 1, H, W)))
    pred_shift = jax.random.normal(k2, (B, C - 1, H, W))
    inputs = jnp.concatenate([pred_prob, pred_shift], axis=1).astype(jnp.float32)

    # Targets: binary prob channel (guarantees nonzero positions exist),
    # continuous shift channels.
    targ_prob = jax.random.bernoulli(k3, 0.3, (B, 1, H, W)).astype(jnp.float32)
    targ_shift = jax.random.normal(k4, (B, C - 1, H, W))
    target = jnp.concatenate([targ_prob, targ_shift], axis=1).astype(jnp.float32)

    loss = jax.block_until_ready(loot_loss(inputs, target, lambda1=1.0, lambda2=0.5))
    ref = jax.block_until_ready(_loot_loss_reference(inputs, target, 1.0, 0.5))
    assert bool(jnp.isfinite(loss)), loss
    assert bool(jnp.allclose(loss, ref, rtol=1e-5, atol=1e-5)), (loss, ref)
    print("KERNEL_OK")
</pallas_src>

<mosaic_0001>
module attributes {stable_mosaic.version = 11 : i64} {
  func.func @_loot_loss_sums_kernel(%arg0: i32, %arg1: i32, %arg2: memref<2x4x256xf32, #tpu.memory_space<vmem>>, %arg3: memref<2x4x256xf32, #tpu.memory_space<vmem>>, %arg4: memref<1x1x1xf32, #tpu.memory_space<vmem>>, %arg5: memref<1x1x1xf32, #tpu.memory_space<vmem>>, %arg6: memref<1x1x1xf32, #tpu.memory_space<vmem>>, %arg7: memref<1x1x1xf32, #tpu.memory_space<vmem>>, %arg8: memref<1x1x1xf32, #tpu.memory_space<vmem>>, %arg9: memref<1x1x1xf32, #tpu.memory_space<vmem>>) attributes {dimension_semantics = [#tpu.dimension_semantics<parallel>, #tpu.dimension_semantics<arbitrary>], iteration_bounds = array<i64: 1, 1>, scalar_prefetch = 0 : i64, scratch_operands = 0 : i64, tpu.core_type = #tpu.core_type<tc>, window_params = [{transform_indices = @transform_0, window_bounds = array<i64: 2, 4, 256>}, {transform_indices = @transform_1, window_bounds = array<i64: 2, 4, 256>}, {transform_indices = @transform_2, window_bounds = array<i64: 1, 1, 1>}, {transform_indices = @transform_3, window_bounds = array<i64: 1, 1, 1>}, {transform_indices = @transform_4, window_bounds = array<i64: 1, 1, 1>}, {transform_indices = @transform_5, window_bounds = array<i64: 1, 1, 1>}, {transform_indices = @transform_6, window_bounds = array<i64: 1, 1, 1>}, {transform_indices = @transform_7, window_bounds = array<i64: 1, 1, 1>}]} {
    %c0_i32 = arith.constant 0 : i32
    %0 = arith.cmpi eq, %arg1, %c0_i32 : i32
    %1 = arith.extui %0 : i1 to i32
    %c0_i32_0 = arith.constant 0 : i32
    %2 = arith.cmpi ne, %1, %c0_i32_0 : i32
    scf.if %2 {
      %cst_58 = arith.constant 0.000000e+00 : f32
      %81 = vector.broadcast %cst_58 : f32 to vector<1x1x1xf32>
      %c0_59 = arith.constant 0 : index
      %c0_60 = arith.constant 0 : index
      %c0_61 = arith.constant 0 : index
      %82 = vector.load %arg4[%c0_59, %c0_60, %c0_61] : memref<1x1x1xf32, #tpu.memory_space<vmem>>, vector<1x1x1xf32>
      tpu.vector_store %arg4[%c0_59, %c0_60, %c0_61], %81 {strides = array<i32>} : memref<1x1x1xf32, #tpu.memory_space<vmem>>, vector<1x1x1xf32>,
      %cst_62 = arith.constant 0.000000e+00 : f32
      %83 = vector.broadcast %cst_62 : f32 to vector<1x1x1xf32>
      %c0_63 = arith.constant 0 : index
      %c0_64 = arith.constant 0 : index
      %c0_65 = arith.constant 0 : index
      %84 = vector.load %arg5[%c0_63, %c0_64, %c0_65] : memref<1x1x1xf32, #tpu.memory_space<vmem>>, vector<1x1x1xf32>
      tpu.vector_store %arg5[%c0_63, %c0_64, %c0_65], %83 {strides = array<i32>} : memref<1x1x1xf32, #tpu.memory_space<vmem>>, vector<1x1x1xf32>,
      %cst_66 = arith.constant 0.000000e+00 : f32
      %85 = vector.broadcast %cst_66 : f32 to vector<1x1x1xf32>
      %c0_67 = arith.constant 0 : index
      %c0_68 = arith.constant 0 : index
      %c0_69 = arith.constant 0 : index
      %86 = vector.load %arg6[%c0_67, %c0_68, %c0_69] : memref<1x1x1xf32, #tpu.memory_space<vmem>>, vector<1x1x1xf32>
      tpu.vector_store %arg6[%c0_67, %c0_68, %c0_69], %85 {strides = array<i32>} : memref<1x1x1xf32, #tpu.memory_space<vmem>>, vector<1x1x1xf32>,
      %cst_70 = arith.constant 0.000000e+00 : f32
      %87 = vector.broadcast %cst_70 : f32 to vector<1x1x1xf32>
      %c0_71 = arith.constant 0 : index
      %c0_72 = arith.constant 0 : index
      %c0_73 = arith.constant 0 : index
      %88 = vector.load %arg7[%c0_71, %c0_72, %c0_73] : memref<1x1x1xf32, #tpu.memory_space<vmem>>, vector<1x1x1xf32>
      tpu.vector_store %arg7[%c0_71, %c0_72, %c0_73], %87 {strides = array<i32>} : memref<1x1x1xf32, #tpu.memory_space<vmem>>, vector<1x1x1xf32>,
      %cst_74 = arith.constant 0.000000e+00 : f32
      %89 = vector.broadcast %cst_74 : f32 to vector<1x1x1xf32>
      %c0_75 = arith.constant 0 : index
      %c0_76 = arith.constant 0 : index
      %c0_77 = arith.constant 0 : index
      %90 = vector.load %arg8[%c0_75, %c0_76, %c0_77] : memref<1x1x1xf32, #tpu.memory_space<vmem>>, vector<1x1x1xf32>
      tpu.vector_store %arg8[%c0_75, %c0_76, %c0_77], %89 {strides = array<i32>} : memref<1x1x1xf32, #tpu.memory_space<vmem>>, vector<1x1x1xf32>,
      %cst_78 = arith.constant 0.000000e+00 : f32
      %91 = vector.broadcast %cst_78 : f32 to vector<1x1x1xf32>
      %c0_79 = arith.constant 0 : index
      %c0_80 = arith.constant 0 : index
      %c0_81 = arith.constant 0 : index
      %92 = vector.load %arg9[%c0_79, %c0_80, %c0_81] : memref<1x1x1xf32, #tpu.memory_space<vmem>>, vector<1x1x1xf32>
      tpu.vector_store %arg9[%c0_79, %c0_80, %c0_81], %91 {strides = array<i32>} : memref<1x1x1xf32, #tpu.memory_space<vmem>>, vector<1x1x1xf32>,
    } else {
    }
    %c0 = arith.constant 0 : index
    %c0_1 = arith.constant 0 : index
    %c0_2 = arith.constant 0 : index
    %3 = vector.load %arg2[%c0, %c0_1, %c0_2] : memref<2x4x256xf32, #tpu.memory_space<vmem>>, vector<2x1x256xf32>
    %c0_3 = arith.constant 0 : index
    %c0_4 = arith.constant 0 : index
    %c0_5 = arith.constant 0 : index
    %4 = vector.load %arg3[%c0_3, %c0_4, %c0_5] : memref<2x4x256xf32, #tpu.memory_space<vmem>>, vector<2x1x256xf32>
    %c0_6 = arith.constant 0 : index
    %c1 = arith.constant 1 : index
    %c0_7 = arith.constant 0 : index
    %5 = vector.load %arg2[%c0_6, %c1, %c0_7] : memref<2x4x256xf32, #tpu.memory_space<vmem>>, vector<2x3x256xf32>
    %c0_8 = arith.constant 0 : index
    %c1_9 = arith.constant 1 : index
    %c0_10 = arith.constant 0 : index
    %6 = vector.load %arg3[%c0_8, %c1_9, %c0_10] : memref<2x4x256xf32, #tpu.memory_space<vmem>>, vector<2x3x256xf32>
    %c0_11 = arith.constant 0 : index
    %c0_12 = arith.constant 0 : index
    %c0_13 = arith.constant 0 : index
    %7 = vector.load %arg4[%c0_11, %c0_12, %c0_13] : memref<1x1x1xf32, #tpu.memory_space<vmem>>, vector<1x1x1xf32>
    %8 = arith.mulf %3, %4 : vector<2x1x256xf32>
    %9 = vector.shape_cast %8 : vector<2x1x256xf32> to vector<1x2x1x256xf32>
    %cst = arith.constant dense<0.000000e+00> : vector<1xf32>
    %10 = vector.multi_reduction <add>, %9, %cst [1, 2, 3] : vector<1x2x1x256xf32> to vector<1xf32>
    %11 = vector.shape_cast %10 : vector<1xf32> to vector<1x1x1x1xf32>
    %12 = vector.extract %11[0, 0, 0, 0] : f32 from vector<1x1x1x1xf32>
    %13 = vector.broadcast %12 : f32 to vector<1x1x1xf32>
    %14 = arith.addf %7, %13 : vector<1x1x1xf32>
    %c0_14 = arith.constant 0 : index
    %c0_15 = arith.constant 0 : index
    %c0_16 = arith.constant 0 : index
    %15 = vector.load %arg4[%c0_14, %c0_15, %c0_16] : memref<1x1x1xf32, #tpu.memory_space<vmem>>, vector<1x1x1xf32>
    tpu.vector_store %arg4[%c0_14, %c0_15, %c0_16], %14 {strides = array<i32>} : memref<1x1x1xf32, #tpu.memory_space<vmem>>, vector<1x1x1xf32>,
    %c0_17 = arith.constant 0 : index
    %c0_18 = arith.constant 0 : index
    %c0_19 = arith.constant 0 : index
    %16 = vector.load %arg5[%c0_17, %c0_18, %c0_19] : memref<1x1x1xf32, #tpu.memory_space<vmem>>, vector<1x1x1xf32>
    %17 = arith.mulf %3, %3 : vector<2x1x256xf32>
    %18 = vector.shape_cast %17 : vector<2x1x256xf32> to vector<1x2x1x256xf32>
    %cst_20 = arith.constant dense<0.000000e+00> : vector<1xf32>
    %19 = vector.multi_reduction <add>, %18, %cst_20 [1, 2, 3] : vector<1x2x1x256xf32> to vector<1xf32>
    %20 = vector.shape_cast %19 : vector<1xf32> to vector<1x1x1x1xf32>
    %21 = vector.extract %20[0, 0, 0, 0] : f32 from vector<1x1x1x1xf32>
    %22 = vector.broadcast %21 : f32 to vector<1x1x1xf32>
    %23 = arith.addf %16, %22 : vector<1x1x1xf32>
    %c0_21 = arith.constant 0 : index
    %c0_22 = arith.constant 0 : index
    %c0_23 = arith.constant 0 : index
    %24 = vector.load %arg5[%c0_21, %c0_22, %c0_23] : memref<1x1x1xf32, #tpu.memory_space<vmem>>, vector<1x1x1xf32>
    tpu.vector_store %arg5[%c0_21, %c0_22, %c0_23], %23 {strides = array<i32>} : memref<1x1x1xf32, #tpu.memory_space<vmem>>, vector<1x1x1xf32>,
    %c0_24 = arith.constant 0 : index
    %c0_25 = arith.constant 0 : index
    %c0_26 = arith.constant 0 : index
    %25 = vector.load %arg6[%c0_24, %c0_25, %c0_26] : memref<1x1x1xf32, #tpu.memory_space<vmem>>, vector<1x1x1xf32>
    %26 = arith.mulf %4, %4 : vector<2x1x256xf32>
    %27 = vector.shape_cast %26 : vector<2x1x256xf32> to vector<1x2x1x256xf32>
    %cst_27 = arith.constant dense<0.000000e+00> : vector<1xf32>
    %28 = vector.multi_reduction <add>, %27, %cst_27 [1, 2, 3] : vector<1x2x1x256xf32> to vector<1xf32>
    %29 = vector.shape_cast %28 : vector<1xf32> to vector<1x1x1x1xf32>
    %30 = vector.extract %29[0, 0, 0, 0] : f32 from vector<1x1x1x1xf32>
    %31 = vector.broadcast %30 : f32 to vector<1x1x1xf32>
    %32 = arith.addf %25, %31 : vector<1x1x1xf32>
    %c0_28 = arith.constant 0 : index
    %c0_29 = arith.constant 0 : index
    %c0_30 = arith.constant 0 : index
    %33 = vector.load %arg6[%c0_28, %c0_29, %c0_30] : memref<1x1x1xf32, #tpu.memory_space<vmem>>, vector<1x1x1xf32>
    tpu.vector_store %arg6[%c0_28, %c0_29, %c0_30], %32 {strides = array<i32>} : memref<1x1x1xf32, #tpu.memory_space<vmem>>, vector<1x1x1xf32>,
    %34 = math.log %3 : vector<2x1x256xf32>
    %cst_31 = arith.constant -1.000000e+02 : f32
    %35 = vector.broadcast %cst_31 : f32 to vector<2x1x256xf32>
    %36 = arith.maximumf %34, %35 : vector<2x1x256xf32>
    %cst_32 = arith.constant 1.000000e+00 : f32
    %37 = vector.broadcast %cst_32 : f32 to vector<2x1x256xf32>
    %38 = arith.subf %37, %3 : vector<2x1x256xf32>
    %39 = math.log %38 : vector<2x1x256xf32>
    %cst_33 = arith.constant -1.000000e+02 : f32
    %40 = vector.broadcast %cst_33 : f32 to vector<2x1x256xf32>
    %41 = arith.maximumf %39, %40 : vector<2x1x256xf32>
    %c0_34 = arith.constant 0 : index
    %c0_35 = arith.constant 0 : index
    %c0_36 = arith.constant 0 : index
    %42 = vector.load %arg7[%c0_34, %c0_35, %c0_36] : memref<1x1x1xf32, #tpu.memory_space<vmem>>, vector<1x1x1xf32>
    %43 = arith.mulf %4, %36 : vector<2x1x256xf32>
    %cst_37 = arith.constant 1.000000e+00 : f32
    %44 = vector.broadcast %cst_37 : f32 to vector<2x1x256xf32>
    %45 = arith.subf %44, %4 : vector<2x1x256xf32>
    %46 = arith.mulf %45, %41 : vector<2x1x256xf32>
    %47 = arith.addf %43, %46 : vector<2x1x256xf32>
    %cst_38 = arith.constant 0.000000e+00 : f32
    %48 = vector.broadcast %cst_38 : f32 to vector<2x1x256xf32>
    %49 = arith.subf %48, %47 : vector<2x1x256xf32>
    %50 = vector.shape_cast %49 : vector<2x1x256xf32> to vector<1x2x1x256xf32>
    %cst_39 = arith.constant dense<0.000000e+00> : vector<1xf32>
    %51 = vector.multi_reduction <add>, %50, %cst_39 [1, 2, 3] : vector<1x2x1x256xf32> to vector<1xf32>
    %52 = vector.shape_cast %51 : vector<1xf32> to vector<1x1x1x1xf32>
    %53 = vector.extract %52[0, 0, 0, 0] : f32 from vector<1x1x1x1xf32>
    %54 = vector.broadcast %53 : f32 to vector<1x1x1xf32>
    %55 = arith.addf %42, %54 : vector<1x1x1xf32>
    %c0_40 = arith.constant 0 : index
    %c0_41 = arith.constant 0 : index
    %c0_42 = arith.constant 0 : index
    %56 = vector.load %arg7[%c0_40, %c0_41, %c0_42] : memref<1x1x1xf32, #tpu.memory_space<vmem>>, vector<1x1x1xf32>
    tpu.vector_store %arg7[%c0_40, %c0_41, %c0_42], %55 {strides = array<i32>} : memref<1x1x1xf32, #tpu.memory_space<vmem>>, vector<1x1x1xf32>,
    %cst_43 = arith.constant 0.000000e+00 : f32
    %57 = vector.broadcast %cst_43 : f32 to vector<2x1x256xf32>
    %58 = arith.cmpf one, %4, %57 : vector<2x1x256xf32>
    %59 = arith.extui %58 : vector<2x1x256xi1> to vector<2x1x256xi32>
    %60 = arith.sitofp %59 : vector<2x1x256xi32> to vector<2x1x256xf32>
    %c0_44 = arith.constant 0 : index
    %c0_45 = arith.constant 0 : index
    %c0_46 = arith.constant 0 : index
    %61 = vector.load %arg8[%c0_44, %c0_45, %c0_46] : memref<1x1x1xf32, #tpu.memory_space<vmem>>, vector<1x1x1xf32>
    %62 = vector.shape_cast %60 : vector<2x1x256xf32> to vector<1x2x1x256xf32>
    %cst_47 = arith.constant dense<0.000000e+00> : vector<1xf32>
    %63 = vector.multi_reduction <add>, %62, %cst_47 [1, 2, 3] : vector<1x2x1x256xf32> to vector<1xf32>
    %64 = vector.shape_cast %63 : vector<1xf32> to vector<1x1x1x1xf32>
    %65 = vector.extract %64[0, 0, 0, 0] : f32 from vector<1x1x1x1xf32>
    %66 = vector.broadcast %65 : f32 to vector<1x1x1xf32>
    %67 = arith.addf %61, %66 : vector<1x1x1xf32>
    %c0_48 = arith.constant 0 : index
    %c0_49 = arith.constant 0 : index
    %c0_50 = arith.constant 0 : index
    %68 = vector.load %arg8[%c0_48, %c0_49, %c0_50] : memref<1x1x1xf32, #tpu.memory_space<vmem>>, vector<1x1x1xf32>
    tpu.vector_store %arg8[%c0_48, %c0_49, %c0_50], %67 {strides = array<i32>} : memref<1x1x1xf32, #tpu.memory_space<vmem>>, vector<1x1x1xf32>,
    %69 = arith.subf %5, %6 : vector<2x3x256xf32>
    %c0_51 = arith.constant 0 : index
    %c0_52 = arith.constant 0 : index
    %c0_53 = arith.constant 0 : index
    %70 = vector.load %arg9[%c0_51, %c0_52, %c0_53] : memref<1x1x1xf32, #tpu.memory_space<vmem>>, vector<1x1x1xf32>
    %71 = arith.mulf %69, %69 : vector<2x3x256xf32>
    %72 = vector.broadcast %60 : vector<2x1x256xf32> to vector<2x3x256xf32>
    %73 = arith.mulf %71, %72 : vector<2x3x256xf32>
    %74 = vector.shape_cast %73 : vector<2x3x256xf32> to vector<1x2x3x256xf32>
    %cst_54 = arith.constant dense<0.000000e+00> : vector<1xf32>
    %75 = vector.multi_reduction <add>, %74, %cst_54 [1, 2, 3] : vector<1x2x3x256xf32> to vector<1xf32>
    %76 = vector.shape_cast %75 : vector<1xf32> to vector<1x1x1x1xf32>
    %77 = vector.extract %76[0, 0, 0, 0] : f32 from vector<1x1x1x1xf32>
    %78 = vector.broadcast %77 : f32 to vector<1x1x1xf32>
    %79 = arith.addf %70, %78 : vector<1x1x1xf32>
    %c0_55 = arith.constant 0 : index
    %c0_56 = arith.constant 0 : index
    %c0_57 = arith.constant 0 : index
    %80 = vector.load %arg9[%c0_55, %c0_56, %c0_57] : memref<1x1x1xf32, #tpu.memory_space<vmem>>, vector<1x1x1xf32>
    tpu.vector_store %arg9[%c0_55, %c0_56, %c0_57], %79 {strides = array<i32>} : memref<1x1x1xf32, #tpu.memory_space<vmem>>, vector<1x1x1xf32>,
    return
  }
  func.func @transform_0(%arg0: i32, %arg1: i32) -> (i32, i32, i32) {
    %c1_i32 = arith.constant 1 : i32
    %0 = arith.muli %arg0, %c1_i32 : i32
    %1 = arith.addi %0, %arg1 : i32
    %c0_i32 = arith.constant 0 : i32
    %c0_i32_0 = arith.constant 0 : i32
    %c0_i32_1 = arith.constant 0 : i32
    return %c0_i32, %c0_i32_0, %1 : i32, i32, i32
  }
  func.func @transform_1(%arg0: i32, %arg1: i32) -> (i32, i32, i32) {
    %c1_i32 = arith.constant 1 : i32
    %0 = arith.muli %arg0, %c1_i32 : i32
    %1 = arith.addi %0, %arg1 : i32
    %c0_i32 = arith.constant 0 : i32
    %c0_i32_0 = arith.constant 0 : i32
    %c0_i32_1 = arith.constant 0 : i32
    return %c0_i32, %c0_i32_0, %1 : i32, i32, i32
  }
  func.func @transform_2(%arg0: i32, %arg1: i32) -> (i32, i32, i32) {
    %c0_i32 = arith.constant 0 : i32
    %c0_i32_0 = arith.constant 0 : i32
    %c0_i32_1 = arith.constant 0 : i32
    return %arg0, %c0_i32, %c0_i32_0 : i32, i32, i32
  }
  func.func @transform_3(%arg0: i32, %arg1: i32) -> (i32, i32, i32) {
    %c0_i32 = arith.constant 0 : i32
    %c0_i32_0 = arith.constant 0 : i32
    %c0_i32_1 = arith.constant 0 : i32
    return %arg0, %c0_i32, %c0_i32_0 : i32, i32, i32
  }
  func.func @transform_4(%arg0: i32, %arg1: i32) -> (i32, i32, i32) {
    %c0_i32 = arith.constant 0 : i32
    %c0_i32_0 = arith.constant 0 : i32
    %c0_i32_1 = arith.constant 0 : i32
    return %arg0, %c0_i32, %c0_i32_0 : i32, i32, i32
  }
  func.func @transform_5(%arg0: i32, %arg1: i32) -> (i32, i32, i32) {
    %c0_i32 = arith.constant 0 : i32
    %c0_i32_0 = arith.constant 0 : i32
    %c0_i32_1 = arith.constant 0 : i32
    return %arg0, %c0_i32, %c0_i32_0 : i32, i32, i32
  }
  func.func @transform_6(%arg0: i32, %arg1: i32) -> (i32, i32, i32) {
    %c0_i32 = arith.constant 0 : i32
    %c0_i32_0 = arith.constant 0 : i32
    %c0_i32_1 = arith.constant 0 : i32
    return %arg0, %c0_i32, %c0_i32_0 : i32, i32, i32
  }
  func.func @transform_7(%arg0: i32, %arg1: i32) -> (i32, i32, i32) {
    %c0_i32 = arith.constant 0 : i32
    %c0_i32_0 = arith.constant 0 : i32
    %c0_i32_1 = arith.constant 0 : i32
    return %arg0, %c0_i32, %c0_i32_0 : i32, i32, i32
  }
}

</mosaic_0001>

<bundles_post_ra>
// kernel: tpu_custom_call.1
= control target key start
LH: loop header
LB: loop body
LE: loop exit
PB: predicated region body
PF: predicated region fallthrough
CT: control target
= control target key end

     0   :  { %13 = vsyncpa [#allocation3], 0  ;;  %s831_s0 = inlined_call_operand.hbm [shape: f32[2,4,256], index: 0, kind: input, shape index: {}]   ;;  %s832_s1 = inlined_call_operand.hbm [shape: f32[2,4,256], index: 1, kind: input, shape index: {}]   ;;  %s833_s2 = inlined_call_operand.hbm [shape: f32[1,1,1], index: 2, kind: output, shape index: {0}]   ;;  %s834_s3 = inlined_call_operand.hbm [shape: f32[1,1,1], index: 3, kind: output, shape index: {1}]   ;;  %s835_s4 = inlined_call_operand.hbm [shape: f32[1,1,1], index: 4, kind: output, shape index: {2}]   ;;  %s836_s5 = inlined_call_operand.hbm [shape: f32[1,1,1], index: 5, kind: output, shape index: {3}]   ;;  %s837_s6 = inlined_call_operand.hbm [shape: f32[1,1,1], index: 6, kind: output, shape index: {4}]   ;;  %s838_s7 = inlined_call_operand.hbm [shape: f32[1,1,1], index: 7, kind: output, shape index: {5}]  }
   0x1   :  { %14 = vsyncpa [#allocation6], 0 }
   0x2   :  { %15 = vsyncpa [#allocation4], 0 }
   0x3   :  { %16 = vsyncpa [#allocation9], 0 }
   0x4   :  { %17 = vsyncpa [#allocation12], 0 }
   0x5   :  { %18 = vsyncpa [#allocation15], 0  ;;  %s664_s24 = smov [#allocation2]  }
   0x6   :  { %s28_s25 = sshll.u32 %s664_s24, 4  ;;  %s29_s25 = int_to_ptr.vmem [resolvable:$true] %s28_s25 }
   0x7   :  { %s500_s26 = scalar_lea.vmem %s29_s25, 256  ;;  %p505_p1 = scmp.lt.s32.totalorder %s29_s25, %s29_s25 }
   0x8   :  { %p501_p0 = scmp.ne.s32.totalorder %s29_s25, %s500_s26  ;;  %p506_p2 = scmp.lt.s32.totalorder %s500_s26, %s500_s26 }
   0xa   :  { %p507_p3 = por %p506_p2, %p505_p1 }
   0xc   :  { %p508_p4 = pnand %p507_p3, %p501_p0 }
   0xe   :  { %511 = shalt.err (!%p508_p4)
}
   0xf   :  { %s665_s27 = smov 128   ;;  %s666_s28 = smov 8  }
  0x10   :  { %34 = dma.hbm_to_vmem [thread:$0]  %s831_s0, 256, %s29_s25, [#allocation3], %s665_s27, %s665_s27, %s666_s28  }
  0x11   :  { %s667_s8 = smov [#allocation5]  }
  0x12   :  { %s44_s9 = sshll.u32 %s667_s8, 4  ;;  %s45_s9 = int_to_ptr.vmem [resolvable:$true] %s44_s9 }
  0x13   :  { %s520_s10 = scalar_lea.vmem %s45_s9, 256  ;;  %p525_p6 = scmp.lt.s32.totalorder %s45_s9, %s45_s9 }
  0x14   :  { %p521_p5 = scmp.ne.s32.totalorder %s45_s9, %s520_s10  ;;  %p526_p7 = scmp.lt.s32.totalorder %s520_s10, %s520_s10 }
  0x16   :  { %p527_p8 = por %p526_p7, %p525_p6 }
  0x18   :  { %p528_p9 = pnand %p527_p8, %p521_p5 }
  0x1a   :  { %531 = shalt.err (!%p528_p9)
}
  0x1b   :  { %50 = dma.hbm_to_vmem [thread:$0]  %s832_s1, 256, %s45_s9, [#allocation6], %s665_s27, %s665_s27, %s666_s28  }
  0x1c   :  { %652 = dma.done.wait [#allocation3], 256  }
  0x1d   :  { %653 = vsyncadd [#allocation3], 4294967040 }
  0x1e   :  { %654 = dma.done.wait [#allocation6], 256  }
  0x1f   :  { %655 = vsyncadd [#allocation6], 4294967040  ;;  %v87_v0 = vlaneseq  ;;  %vm107_vm0 = vcmask 1040384   ;;  %v72_v4 = vld [vmem:[#allocation2] ss:$4 sm:$0x3] }
  0x20   :  { %v74_v5 = vld [vmem:[#allocation2 + $0x8] ss:$4 sm:$0x3]  ;;  %v725_v6 = vld [vmem:[#allocation5] ss:$4 sm:$0x3]  ;;  %484 = vlog2.f32 %v72_v4  ;;  %v129_v8 = vmul.f32 %v72_v4, %v72_v4 }
  0x21   :  { %v88_v1 = vshrl.u32 %v87_v0, 7  ;;  %v727_v7 = vld [vmem:[#allocation5 + $0x8] ss:$4 sm:$0x3]  ;;  %v130_v9 = vmul.f32 %v74_v5, %v74_v5  ;;  %v83_v10 = vmul.f32 %v725_v6, %v72_v4  ;;  %486 = vlog2.f32 %v74_v5  ;;  %v78_v45 = vld [vmem:[#allocation2] sm:$0xee] }
  0x22   :  { %v84_v11 = vmul.f32 %v727_v7, %v74_v5  ;;  %v222_v12 = vsub.f32 1.0, %v72_v4  ;;  %v223_v13 = vsub.f32 1.0, %v74_v5  ;;  %v173_v14 = vmul.f32 %v725_v6, %v725_v6  ;;  %v79_v46 = vld [vmem:[#allocation2 + $0x8] sm:$0xee]  ;;  %v80_v47 = vld [vmem:[#allocation5] sm:$0xee] }
  0x23   :  { %v721_v2 = vsub.s32 0, %v88_v1  ;;  %v723_v3 = vsub.s32 1, %v88_v1  ;;  %v174_v15 = vmul.f32 %v727_v7, %v727_v7  ;;  %vm282_vm1 = vcmp.ne.f32.partialorder %v725_v6, 0.0  ;;  %v81_v51 = vld [vmem:[#allocation5 + $0x8] sm:$0xee]  ;;  %s669_s1 = smov [#allocation7]  }
  0x24   :  { %488 = vlog2.f32 %v222_v12  ;;  %vm283_vm2 = vcmp.ne.f32.partialorder %v727_v7, 0.0  ;;  %v668_v49 = vmov 0.0   ;;  %v330_v60 = vsub.f32 %v78_v45, %v80_v47  ;;  %s381_s13 = sshll.u32 %s669_s1, 4  ;;  %s670_s14 = smov [#allocation8]   ;;  %s382_s13 = int_to_ptr.vmem [resolvable:$true] %s381_s13 }
  0x25   :  { %v136_v16 = vrot.slane %v129_v8, %v721_v2  ;;  %v90_v17 = vrot.slane %v83_v10, %v721_v2  ;;  %v94_v18 = vrot.slane %v83_v10, %v723_v3  ;;  %v98_v19 = vrot.slane %v84_v11, %v721_v2  ;;  %s391_s15 = sshll.u32 %s670_s14, 4  ;;  %s671_s17 = smov [#allocation10]   ;;  %s392_s15 = int_to_ptr.vmem [resolvable:$true] %s391_s15 }
  0x26   :  { %v102_v20 = vrot.slane %v84_v11, %v723_v3  ;;  %v180_v21 = vrot.slane %v173_v14, %v721_v2  ;;  %v184_v22 = vrot.slane %v173_v14, %v723_v3  ;;  %v188_v23 = vrot.slane %v174_v15, %v721_v2  ;;  %s401_s18 = sshll.u32 %s671_s17, 4  ;;  %s532_s20 = scalar_lea.vmem %s382_s13, 16  ;;  %s402_s18 = int_to_ptr.vmem [resolvable:$true] %s401_s18 }
  0x27   :  { %v108_v24 = vsel %vm107_vm0, %v90_v17, 0.0  ;;  %v109_v25 = vsel %vm107_vm0, %v94_v18, 0.0  ;;  %v111_v26 = vsel %vm107_vm0, %v98_v19, 0.0  ;;  %490 = vlog2.f32 %v223_v13  ;;  %p533_p10 = scmp.ne.s32.totalorder %s382_s13, %s532_s20  ;;  %s536_s21 = scalar_lea.vmem %s382_s13, 32 }
  0x28   :  { %v113_v27 = vsel %vm107_vm0, %v102_v20, 0.0  ;;  %v110_v28 = vadd.f32 %v109_v25, %v108_v24  ;;  %v192_v29 = vrot.slane %v174_v15, %v723_v3  ;;  %v197_v30 = vsel %vm107_vm0, %v180_v21, 0.0  ;;  %p537_p11 = scmp.lt.s32.totalorder %s382_s13, %s382_s13  ;;  %p538_p12 = scmp.lt.s32.totalorder %s536_s21, %s532_s20 }
  0x29   :  { %v198_v31 = vsel %vm107_vm0, %v184_v22, 0.0  ;;  %v200_v32 = vsel %vm107_vm0, %v188_v23, 0.0  ;;  %v140_v33 = vrot.slane %v129_v8, %v723_v3  ;;  %v144_v34 = vrot.slane %v130_v9, %v721_v2 }
  0x2a   :  { %v112_v35 = vadd.f32 %v111_v26, %v110_v28  ;;  %v199_v36 = vadd.f32 %v198_v31, %v197_v30  ;;  %v202_v37 = vsel %vm107_vm0, %v192_v29, 0.0  ;;  %v148_v38 = vrot.slane %v130_v9, %v723_v3  ;;  %p539_p13 = por %p538_p12, %p537_p11 }
  0x2b   :  { %v153_v39 = vsel %vm107_vm0, %v136_v16, 0.0  ;;  %v154_v40 = vsel %vm107_vm0, %v140_v33, 0.0  ;;  %v156_v41 = vsel %vm107_vm0, %v144_v34, 0.0  ;;  %v459_v50 = vsel %vm282_vm1, 1.0, %v668_v49 }
  0x2c   :  { %v114_v42 = vadd.f32 %v113_v27, %v112_v35  ;;  %v201_v43 = vadd.f32 %v200_v32, %v199_v36  ;;  %v155_v44 = vadd.f32 %v154_v40, %v153_v39  ;;  %v158_v48 = vsel %vm107_vm0, %v148_v38, 0.0  ;;  %p540_p0 = pnand %p539_p13, %p533_p10 }
  0x2d   :  { %v460_v54 = vsel %vm283_vm2, 1.0, %v668_v49  ;;  %v294_v55 = vrot.slane %v459_v50, %v721_v2  ;;  %v485_v56 = vpop.eup %484  ;;  %v298_v57 = vrot.slane %v459_v50, %v723_v3  ;;  %v331_v1 = vsub.f32 %v79_v46, %v81_v51 }
  0x2e   :  { %115 = vadd.xlane.f32.xlu0 %v114_v42  ;;  %v203_v52 = vadd.f32 %v202_v37, %v201_v43  ;;  %v157_v53 = vadd.f32 %v156_v41, %v155_v44  ;;  %v302_v58 = vrot.slane %v460_v54, %v721_v2  ;;  %v306_v59 = vrot.slane %v460_v54, %v723_v3  ;;  %v487_v61 = vpop.eup %486 }
  0x2f   :  { %v311_v63 = vsel %vm107_vm0, %v294_v55, 0.0  ;;  %v217_v0 = vmul.f32 0.6931472, %v485_v56  ;;  %v312_v4 = vsel %vm107_vm0, %v298_v57, 0.0  ;;  %v335_v8 = vcombine.low %v294_v55, %v298_v57 }
  0x30   :  { %204 = vadd.xlane.f32.xlu1 %v203_v52  ;;  %v159_v62 = vadd.f32 %v158_v48, %v157_v53  ;;  %v314_v5 = vsel %vm107_vm0, %v302_v58, 0.0  ;;  %v233_v9 = vsub.f32 1.0, %v725_v6  ;;  %v313_v10 = vadd.f32 %v312_v4, %v311_v63 }
  0x31   :  { %v336_v11 = vcombine.low %v302_v58, %v306_v59  ;;  %v219_v12 = vmul.f32 0.6931472, %v487_v61  ;;  %v220_v13 = vmax.f32 %v217_v0, -100.0  ;;  %v489_v14 = vpop.eup %488  ;;  %v316_v15 = vsel %vm107_vm0, %v306_v59, 0.0 }
  0x32   :  { %160 = vadd.xlane.f32.xlu0 %v159_v62  ;;  %v337_v16 = vrot.slane %v335_v8, 7  ;;  %v333_v17 = vmul.f32 %v330_v60, %v330_v60  ;;  %v334_v18 = vmul.f32 %v331_v1, %v331_v1  ;;  %v315_v19 = vadd.f32 %v314_v5, %v313_v10 }
  0x33   :  { %v338_v20 = vrot.slane %v336_v11, 7  ;;  %v221_v21 = vmax.f32 %v219_v12, -100.0  ;;  %v225_v22 = vmul.f32 0.6931472, %v489_v14  ;;  %v234_v24 = vsub.f32 1.0, %v727_v7 }
  0x34   :  { %v491_v23 = vpop.eup %490  ;;  %v341_v25 = vmul.f32 %v337_v16, %v333_v17  ;;  %v317_v26 = vadd.f32 %v316_v15, %v315_v19  ;;  %v231_v29 = vmul.f32 %v220_v13, %v725_v6  ;;  %vm355_vm3 = vcmask 1042432  }
  0x35   :  { %v227_v27 = vmul.f32 0.6931472, %v491_v23  ;;  %v228_v28 = vmax.f32 %v225_v22, -100.0  ;;  %v342_v30 = vmul.f32 %v338_v20, %v334_v18  ;;  %v232_v33 = vmul.f32 %v221_v21, %v727_v7 }
  0x36   :  { %v345_v31 = vcombine.high %v341_v25, %v341_v25  ;;  %318 = vadd.xlane.f32.xlu0 %v317_v26  ;;  %v347_v35 = vrot.slane %v341_v25, 1  ;;  %vm65_vm4 = vcmask 0  }
  0x37   :  { %v229_v32 = vmax.f32 %v227_v27, -100.0  ;;  %v235_v34 = vmul.f32 %v233_v9, %v228_v28  ;;  %v346_v39 = vcombine.high %v342_v30, %v342_v30  ;;  %v349_v40 = vrot.slane %v342_v30, 1  ;;  %66 = vst.msk [vmem:[#allocation7] sm:$0x1] %vm65_vm4, %v668_v49  ;;  %67 = vst.msk [vmem:[#allocation8] sm:$0x1] %vm65_vm4, %v668_v49 }
  0x38   :  { %v348_v36 = vrot.slane %v345_v31, 1  ;;  %v356_v43 = vsel %vm355_vm3, %v347_v35, 0.0  ;;  %68 = vst.msk [vmem:[#allocation10] sm:$0x1] %vm65_vm4, %v668_v49  ;;  %69 = vst.msk [vmem:[#allocation11] sm:$0x1] %vm65_vm4, %v668_v49 }
  0x39   :  { %v236_v37 = vmul.f32 %v234_v24, %v229_v32  ;;  %v237_v38 = vadd.f32 %v235_v34, %v231_v29  ;;  %v350_v7 = vrot.slane %v346_v39, 1  ;;  %v359_v48 = vsel %vm355_vm3, %v349_v40, 0.0  ;;  %70 = vst.msk [vmem:[#allocation13] sm:$0x1] %vm65_vm4, %v668_v49  ;;  %71 = vst.msk [vmem:[#allocation14] sm:$0x1] %vm65_vm4, %v668_v49 }
  0x3a   :  { %v357_v6 = vsel %vm355_vm3, %v348_v36, 0.0 }
  0x3b   :  { %v238_v41 = vadd.f32 %v236_v37, %v232_v33  ;;  %v239_v42 = vsub.f32 0.0, %v237_v38  ;;  %v358_v47 = vadd.f32 %v357_v6, %v356_v43  ;;  %v361_v59 = vsel %vm355_vm3, %v350_v7, 0.0 }
  0x3d   :  { %v240_v44 = vsub.f32 0.0, %v238_v41  ;;  %v246_v45 = vrot.slane %v239_v42, %v721_v2  ;;  %v250_v46 = vrot.slane %v239_v42, %v723_v3  ;;  %v360_v58 = vadd.f32 %v359_v48, %v358_v47 }
  0x3e   :  { %v82_v41 = vld [vmem:[#allocation7] sm:$0x1]  ;;  %v128_v6 = vld [vmem:[#allocation8] sm:$0x1] }
  0x3f   :  { %v254_v50 = vrot.slane %v240_v44, %v721_v2  ;;  %v258_v51 = vrot.slane %v240_v44, %v723_v3  ;;  %v263_v52 = vsel %vm107_vm0, %v246_v45, 0.0  ;;  %v264_v53 = vsel %vm107_vm0, %v250_v46, 0.0  ;;  %v172_v44 = vld [vmem:[#allocation10] sm:$0x1] }
  0x40   :  { %v265_v54 = vadd.f32 %v264_v53, %v263_v52  ;;  %v362_v61 = vadd.f32 %v361_v59, %v360_v58 }
  0x41   :  { %v266_v55 = vsel %vm107_vm0, %v254_v50, 0.0  ;;  %v268_v56 = vsel %vm107_vm0, %v258_v51, 0.0 }
  0x42   :  { %v267_v57 = vadd.f32 %v266_v55, %v265_v54 }
  0x44   :  { %v269_v60 = vadd.f32 %v268_v56, %v267_v57 }
  0x46   :  { %270 = vadd.xlane.f32.xlu1 %v269_v60 }
  0x4a   :  { %363 = vadd.xlane.f32.xlu1 %v362_v61 }
  0xb7   :  { %v116_v2 = vpop.xlane.xlu0 %115 }
  0xb8   :  { %v117_v3 = vrot.slane %v116_v2, 4 }
  0xb9   :  { %v205_v62 = vpop.xlane.xlu1 %204 }
  0xba   :  { %v118_v63 = vadd.f32 %v117_v3, %v116_v2  ;;  %v206_v0 = vrot.slane %v205_v62, 4 }
  0xbb   :  { %v161_v1 = vpop.xlane.xlu0 %160 }
  0xbc   :  { %v119_v4 = vrot.slane %v118_v63, 2  ;;  %v207_v5 = vadd.f32 %v206_v0, %v205_v62  ;;  %v162_v8 = vrot.slane %v161_v1, 4 }
  0xbe   :  { %v208_v9 = vrot.slane %v207_v5, 2  ;;  %v163_v10 = vadd.f32 %v162_v8, %v161_v1  ;;  %v120_v11 = vadd.f32 %v119_v4, %v118_v63 }
  0xbf   :  { %v319_v18 = vpop.xlane.xlu0 %318 }
  0xc0   :  { %v164_v12 = vrot.slane %v163_v10, 2  ;;  %v121_v13 = vrot.slane %v120_v11, 1  ;;  %v209_v14 = vadd.f32 %v208_v9, %v207_v5  ;;  %v320_v21 = vrot.slane %v319_v18, 4 }
  0xc2   :  { %v122_v15 = vadd.f32 %v121_v13, %v120_v11  ;;  %v165_v16 = vadd.f32 %v164_v12, %v163_v10  ;;  %v210_v17 = vrot.slane %v209_v14, 1  ;;  %v321_v22 = vadd.f32 %v320_v21, %v319_v18 }
  0xc4   :  { %461 = vpush %v122_v15  ;;  %v166_v49 = vrot.slane %v165_v16, 1  ;;  %v211_v19 = vadd.f32 %v210_v17, %v209_v14  ;;  %v322_v23 = vrot.slane %v321_v22, 2 }
  0xc6   :  { %v167_v20 = vadd.f32 %v166_v49, %v165_v16  ;;  %v323_v27 = vadd.f32 %v322_v23, %v321_v22 }
  0xc8   :  { %463 = vpush %v167_v20  ;;  %v324_v33 = vrot.slane %v323_v27, 1 }
  0xc9   :  { %465 = vpush %v211_v19 }
  0xca   :  { %v325_v38 = vadd.f32 %v324_v33, %v323_v27 }
  0xcf   :  { %v271_v24 = vpop.xlane.xlu1 %270 }
  0xd0   :  { %v272_v25 = vrot.slane %v271_v24, 4 }
  0xd2   :  { %v273_v26 = vadd.f32 %v272_v25, %v271_v24 }
  0xd3   :  { %v364_v28 = vpop.xlane.xlu1 %363 }
  0xd4   :  { %v274_v29 = vrot.slane %v273_v26, 2  ;;  %v365_v30 = vrot.slane %v364_v28, 4 }
  0xd6   :  { %v366_v31 = vadd.f32 %v365_v30, %v364_v28  ;;  %v275_v32 = vadd.f32 %v274_v29, %v273_v26 }
  0xd8   :  { %v367_v34 = vrot.slane %v366_v31, 2  ;;  %v276_v35 = vrot.slane %v275_v32, 1 }
  0xda   :  { %v368_v36 = vadd.f32 %v367_v34, %v366_v31  ;;  %v277_v37 = vadd.f32 %v276_v35, %v275_v32 }
  0xdc   :  { %467 = vpush %v277_v37  ;;  %v369_v39 = vrot.slane %v368_v36, 1 }
  0xdd   :  { %469 = vpush %v325_v38 }
  0xde   :  { %v370_v40 = vadd.f32 %v369_v39, %v368_v36 }
  0xe0   :  { %471 = vpush %v370_v40 }
  0xf5   :  { %s462_s0 = spop %461 }
  0xf6   :  { %v124_v42 = vstv %s462_s0 }
  0xf7   :  { %v125_v43 = vadd.f32 %v124_v42, %v82_v41 }
  0xf9   :  { %127 = vst.msk [vmem:[#allocation7] sm:$0x1] %vm65_vm4, %v125_v43  ;;  %s464_s16 = spop %463 }
  0xfa   :  { %v169_v45 = vstv %s464_s16  ;;  %s466_s19 = spop %465 }
  0xfb   :  { %v170_v46 = vadd.f32 %v169_v45, %v128_v6  ;;  %v213_v7 = vstv %s466_s19 }
  0xfc   :  { %543 = shalt.err (!%p540_p0)
}
  0xfd   :  { %384 = dma.vmem_to_hbm [thread:$0]  %s382_s13, 16, %s833_s2, [#allocation4]   ;;  %v214_v47 = vadd.f32 %v213_v7, %v172_v44  ;;  %171 = vst.msk [vmem:[#allocation8] sm:$0x1] %vm65_vm4, %v170_v46 }
  0xfe   :  { %s552_s24 = scalar_lea.vmem %s392_s15, 16  ;;  %s556_s25 = scalar_lea.vmem %s392_s15, 32 }
  0xff   :  { %215 = vst.msk [vmem:[#allocation10] sm:$0x1] %vm65_vm4, %v214_v47  ;;  %p553_p1 = scmp.ne.s32.totalorder %s392_s15, %s552_s24  ;;  %p557_p2 = scmp.lt.s32.totalorder %s392_s15, %s392_s15 }
 0x100   :  { %p558_p3 = scmp.lt.s32.totalorder %s556_s25, %s552_s24 }
 0x102   :  { %p559_p4 = por %p558_p3, %p557_p2 }
 0x104   :  { %p560_p5 = pnand %p559_p4, %p553_p1 }
 0x106   :  { %563 = shalt.err (!%p560_p5)
}
 0x107   :  { %394 = dma.vmem_to_hbm [thread:$0]  %s392_s15, 16, %s834_s3, [#allocation9]  }
 0x108   :  { %s572_s28 = scalar_lea.vmem %s402_s18, 16  ;;  %s576_s2 = scalar_lea.vmem %s402_s18, 32 }
 0x109   :  { %p573_p6 = scmp.ne.s32.totalorder %s402_s18, %s572_s28  ;;  %p577_p7 = scmp.lt.s32.totalorder %s402_s18, %s402_s18 }
 0x10a   :  { %p578_p8 = scmp.lt.s32.totalorder %s576_s2, %s572_s28 }
 0x10c   :  { %p579_p9 = por %p578_p8, %p577_p7 }
 0x10e   :  { %p580_p10 = pnand %p579_p9, %p573_p6 }
 0x110   :  { %583 = shalt.err (!%p580_p10)
}
 0x111   :  { %404 = dma.vmem_to_hbm [thread:$0]  %s402_s18, 16, %s835_s4, [#allocation9]   ;;  %v230_v48 = vld [vmem:[#allocation11] sm:$0x1]  ;;  %v288_v50 = vld [vmem:[#allocation13] sm:$0x1] }
 0x112   :  { %s672_s8 = smov [#allocation11]   ;;  %s468_s10 = spop %467  ;;  %v332_v55 = vld [vmem:[#allocation14] sm:$0x1] }
 0x113   :  { %s411_s9 = sshll.u32 %s672_s8, 4  ;;  %s673_s11 = smov [#allocation13]   ;;  %v279_v51 = vstv %s468_s10  ;;  %s412_s9 = int_to_ptr.vmem [resolvable:$true] %s411_s9 }
 0x114   :  { %s421_s12 = sshll.u32 %s673_s11, 4  ;;  %s470_s3 = spop %469  ;;  %v280_v52 = vadd.f32 %v279_v51, %v230_v48  ;;  %s422_s12 = int_to_ptr.vmem [resolvable:$true] %s421_s12 }
 0x115   :  { %s674_s0 = smov [#allocation14]   ;;  %v327_v53 = vstv %s470_s3  ;;  %s472_s4 = spop %471 }
 0x116   :  { %s431_s1 = sshll.u32 %s674_s0, 4  ;;  %v328_v54 = vadd.f32 %v327_v53, %v288_v50  ;;  %281 = vst.msk [vmem:[#allocation11] sm:$0x1] %vm65_vm4, %v280_v52  ;;  %v372_v56 = vstv %s472_s4  ;;  %s592_s13 = scalar_lea.vmem %s412_s9, 16  ;;  %s812_s1 = int_to_ptr.vmem [resolvable:$true] %s431_s1 }
 0x117   :  { %p593_p11 = scmp.ne.s32.totalorder %s412_s9, %s592_s13  ;;  %s596_s14 = scalar_lea.vmem %s412_s9, 32 }
 0x118   :  { %329 = vst.msk [vmem:[#allocation13] sm:$0x1] %vm65_vm4, %v328_v54  ;;  %p597_p12 = scmp.lt.s32.totalorder %s412_s9, %s412_s9  ;;  %p598_p13 = scmp.lt.s32.totalorder %s596_s14, %s592_s13 }
 0x11a   :  { %p599_p0 = por %p598_p13, %p597_p12 }
 0x11c   :  { %p600_p1 = pnand %p599_p0, %p593_p11 }
 0x11e   :  { %603 = shalt.err (!%p600_p1)
}
 0x11f   :  { %414 = dma.vmem_to_hbm [thread:$0]  %s412_s9, 16, %s836_s5, [#allocation12]   ;;  %v373_v57 = vadd.f32 %v372_v56, %v332_v55 }
 0x120   :  { %s612_s17 = scalar_lea.vmem %s422_s12, 16  ;;  %s616_s18 = scalar_lea.vmem %s422_s12, 32 }
 0x121   :  { %p613_p2 = scmp.ne.s32.totalorder %s422_s12, %s612_s17  ;;  %p617_p3 = scmp.lt.s32.totalorder %s422_s12, %s422_s12 }
 0x122   :  { %p618_p4 = scmp.lt.s32.totalorder %s616_s18, %s612_s17 }
 0x124   :  { %p619_p5 = por %p618_p4, %p617_p3 }
 0x126   :  { %p620_p6 = pnand %p619_p5, %p613_p2 }
 0x128   :  { %623 = shalt.err (!%p620_p6)
}
 0x129   :  { %424 = dma.vmem_to_hbm [thread:$0]  %s422_s12, 16, %s837_s6, [#allocation12]   ;;  %374 = vst.msk [vmem:[#allocation14] sm:$0x1] %vm65_vm4, %v373_v57 }
 0x12a   :  { %s632_s5 = scalar_lea.vmem %s812_s1, 16  ;;  %s636_s21 = scalar_lea.vmem %s812_s1, 32 }
 0x12b   :  { %p633_p7 = scmp.ne.s32.totalorder %s812_s1, %s632_s5  ;;  %p637_p8 = scmp.lt.s32.totalorder %s812_s1, %s812_s1 }
 0x12c   :  { %p638_p9 = scmp.lt.s32.totalorder %s636_s21, %s632_s5 }
 0x12e   :  { %p639_p10 = por %p638_p9, %p637_p8 }
 0x130   :  { %p640_p11 = pnand %p639_p10, %p633_p7 }
 0x132   :  { %643 = shalt.err (!%p640_p11)
}
 0x133   :  { %434 = dma.vmem_to_hbm [thread:$0]  %s812_s1, 16, %s838_s7, [#allocation15]  }
 0x134   :  { %656 = dma.done.wait [#allocation4], 16  }
 0x135   :  { %657 = vsyncadd [#allocation4], 4294967280 }
 0x136   :  { %658 = dma.done.wait [#allocation9], 32  }
 0x137   :  { %659 = vsyncadd [#allocation9], 4294967264 }
 0x138   :  { %660 = dma.done.wait [#allocation12], 32  }
 0x139   :  { %661 = vsyncadd [#allocation12], 4294967264 }
 0x13a   :  { %662 = dma.done.wait [#allocation15], 16  }
 0x13b   :  { %663 = vsyncadd [#allocation15], 4294967280 }
 0x13c   :  { %453 = vsyncpa [#allocation3], 1 }
 0x13d   :  { %454 = vsyncpa [#allocation6], 1 }
 0x13e   :  { %455 = vsyncpa [#allocation4], 1 }
 0x13f   :  { %456 = vsyncpa [#allocation9], 1 }
 0x140   :  { %457 = vsyncpa [#allocation12], 1 }
 0x141   :  { %458 = vsyncpa [#allocation15], 1 }

</bundles_post_ra>
